<compile_context>
chip_gen: v7x
topology: tpu7x:2x2x1
jax: 0.10.0
libtpu: 0.0.40
codegen_flags: <defaults>
</compile_context>

<pallas_src>
import jax
import jax.numpy as jnp
from jax.experimental import pallas as pl
from jax.experimental.pallas import tpu as pltpu


def _scale_rows_kernel(x_ref, diag_ref, o_ref):
    # x_ref: (TB, D) tile of the input; diag_ref: (1, D) resident diag(W).
    # Steady state is a single vld / vmul / vst per vreg (pure VPU, HBM-bound).
    o_ref[...] = x_ref[...] * diag_ref[...]


def transformation_layer(x, W, *, block_rows=512):
    """out = einsum('bd,dd->bd', x, W)  ==  x * diag(W) (broadcast over batch)."""
    B, D = x.shape
    assert W.shape == (D, D)

    # Pull out the diagonal on the XLA side: only D weight elements ever reach
    # the kernel instead of the full D x D matrix.
    w_diag = jnp.diagonal(W).reshape(1, D).astype(x.dtype)

    # Pick the largest sublane-aligned batch tile that divides B (capped at
    # block_rows). Pallas double-buffers each streamed tile, so VMEM use is
    # ~2 * (TB*D) * itemsize for x plus the same for out plus one (1, D) diag.
    sublane = 16 if jnp.dtype(x.dtype).itemsize < 4 else 8
    tb = min(block_rows, B)
    if tb != B:
        tb = max(sublane, (tb // sublane) * sublane)
        while B % tb != 0:
            tb -= sublane
            if tb <= 0:
                tb = B  # fall back to a single full-extent block
                break
    grid = (B // tb,)

    return pl.pallas_call(
        _scale_rows_kernel,
        out_shape=jax.ShapeDtypeStruct((B, D), x.dtype),
        grid=grid,
        in_specs=[
            pl.BlockSpec((tb, D), lambda i: (i, 0)),  # stream x batch tiles
            pl.BlockSpec((1, D), lambda i: (0, 0)),   # diag(W) stays resident
        ],
        out_specs=pl.BlockSpec((tb, D), lambda i: (i, 0)),
        compiler_params=pltpu.CompilerParams(
            # Batch tiles are independent -> allow megacore sharding (v7x).
            dimension_semantics=("parallel",),
        ),
    )(x, w_diag)


def xavier_normal(key, dim, dtype=jnp.float32):
    # nn.init.xavier_normal_ on a (dim, dim) matrix: std = sqrt(2/(dim+dim))
    std = (2.0 / (dim + dim)) ** 0.5
    return std * jax.random.normal(key, (dim, dim), dtype=dtype)


if __name__ == "__main__":
    key = jax.random.PRNGKey(0)
    k_x, k_w = jax.random.split(key)

    # Small but multi-tile: B=64 rows with 16-row tiles -> grid of 4 steps.
    B, D = 64, 256
    x = jax.random.normal(k_x, (B, D), dtype=jnp.float32)
    W = xavier_normal(k_w, D)

    # NOTE: at shapes this tiny a fused XLA `x * jnp.diagonal(W)` would win on
    # launch overhead; the Pallas path is exercised here to validate the
    # kernel, and pays off once B*D is large enough to be HBM-bound.
    out = transformation_layer(x, W, block_rows=16)
    out = jax.block_until_ready(out)

    # Reference (plain JAX einsum, identical semantics to torch.einsum).
    ref = jnp.einsum("bd,dd->bd", x, W)
    assert out.shape == (B, D)
    assert jnp.allclose(out, ref, atol=1e-6, rtol=1e-6), "mismatch vs reference"

    print("KERNEL_OK")
</pallas_src>

<mosaic_0001>
module attributes {stable_mosaic.version = 11 : i64} {
  func.func @_scale_rows_kernel(%arg0: i32, %arg1: memref<16x256xf32, #tpu.memory_space<vmem>>, %arg2: memref<1x256xf32, #tpu.memory_space<vmem>>, %arg3: memref<16x256xf32, #tpu.memory_space<vmem>>) attributes {dimension_semantics = [#tpu.dimension_semantics<parallel>], iteration_bounds = array<i64: 4>, scalar_prefetch = 0 : i64, scratch_operands = 0 : i64, tpu.core_type = #tpu.core_type<tc>, window_params = [{transform_indices = @transform_0, window_bounds = array<i64: 16, 256>}, {pipeline_mode = #tpu.pipeline_mode<synchronous>, transform_indices = @transform_1, window_bounds = array<i64: 1, 256>}, {transform_indices = @transform_2, window_bounds = array<i64: 16, 256>}]} {
    %c0 = arith.constant 0 : index
    %c0_0 = arith.constant 0 : index
    %0 = vector.load %arg1[%c0, %c0_0] : memref<16x256xf32, #tpu.memory_space<vmem>>, vector<16x256xf32>
    %c0_1 = arith.constant 0 : index
    %c0_2 = arith.constant 0 : index
    %1 = vector.load %arg2[%c0_1, %c0_2] : memref<1x256xf32, #tpu.memory_space<vmem>>, vector<1x256xf32>
    %2 = vector.broadcast %1 : vector<1x256xf32> to vector<16x256xf32>
    %3 = arith.mulf %0, %2 : vector<16x256xf32>
    %c0_3 = arith.constant 0 : index
    %c0_4 = arith.constant 0 : index
    %4 = vector.load %arg3[%c0_3, %c0_4] : memref<16x256xf32, #tpu.memory_space<vmem>>, vector<16x256xf32>
    tpu.vector_store %arg3[%c0_3, %c0_4], %3 {strides = array<i32>} : memref<16x256xf32, #tpu.memory_space<vmem>>, vector<16x256xf32>,
    return
  }
  func.func @transform_0(%arg0: i32) -> (i32, i32) {
    %c0_i32 = arith.constant 0 : i32
    %c0_i32_0 = arith.constant 0 : i32
    return %arg0, %c0_i32 : i32, i32
  }
  func.func @transform_1(%arg0: i32) -> (i32, i32) {
    %c0_i32 = arith.constant 0 : i32
    %c0_i32_0 = arith.constant 0 : i32
    %c0_i32_1 = arith.constant 0 : i32
    return %c0_i32, %c0_i32_0 : i32, i32
  }
  func.func @transform_2(%arg0: i32) -> (i32, i32) {
    %c0_i32 = arith.constant 0 : i32
    %c0_i32_0 = arith.constant 0 : i32
    return %arg0, %c0_i32 : i32, i32
  }
}

</mosaic_0001>

<bundles_post_ra>
// kernel: tpu_custom_call.1
= control target key start
LH: loop header
LB: loop body
LE: loop exit
PB: predicated region body
PF: predicated region fallthrough
CT: control target
= control target key end

     0   :  { %7 = vsyncpa [#allocation3], 0  ;;  %s629_s0 = inlined_call_operand.hbm [shape: f32[64,256], index: 0, kind: input, shape index: {}]   ;;  %s630_s1 = inlined_call_operand.vmem [shape: f32[1,256], index: 1, kind: input, shape index: {}]   ;;  %s631_s2 = inlined_call_operand.hbm [shape: f32[64,256], index: 2, kind: output, shape index: {}]  }
   0x1   :  { %9 = vsyncpa [#allocation3 + $0x1], 0 }
   0x2   :  { %10 = vsyncpa [#allocation4], 0 }
   0x3   :  { %12 = vsyncpa [#allocation4 + $0x1], 0  ;;  %s466_s9 = smov 0   ;;  %s468_s10 = smov 0  }
   0x4   :  { %s470_s11 = smov 0   ;;  %s472_s12 = smov 0  }
   0x5 LB: > { %s487_s13 = sadd.s32 4294967295, %s443_s12   ;;  %s277_s14 = sadd.s32 4294967294, %s443_s12   ;;  %s443_s12 = sphi %s472_s12, %s643_s12   ;;  %s439_s11 = sphi %s470_s11, %s642_s11   ;;  %s435_s10 = sphi %s468_s10, %s641_s10   ;;  %s431_s9 = sphi %s466_s9, %s640_s9  }
   0x6   : > { %s491_s15 = sadd.s32 1, %s443_s12   ;;  %s25_s16 = sadd.s32 1, %s439_s11 }
   0x7   : > { %s22_s17 = ssub.s32 %s443_s12, %s491_s15  ;;  %p32_p0 = scmp.ne.s32.totalorder %s439_s11, %s435_s10 }
   0x8   : > { %p23_p1 = scmp.eq.s32.totalorder %s22_s17, 0  ;;  %p33_p2 = scmp.eq.s32.totalorder %s443_s12, 0 }
   0x9   : > { %p38_p3 = scmp.ne.s32.totalorder %s435_s10, %s431_s9  ;;  %p39_p4 = scmp.eq.s32.totalorder %s487_s13, 0 }
   0xa   : > { %s503_s18 = scalar_select %p23_p1, %s439_s11, %s25_s16  }
   0xb   : > { %p505_p5 = por %p33_p2, %p32_p0  ;;  %p509_p6 = por %p39_p4, %p38_p3 }
   0xc   : > { %p83_p7 = scmp.eq.s32.totalorder %s487_s13, 3  ;;  %p89_p8 = scmp.eq.s32.totalorder %s277_s14, 3 }
   0xd   : > { %p309_p9 = scmp.lt.s32.totalorder %s443_s12, 4  ;;  %s112_s23 = sand.u32 1, %s439_s11  }
   0xe   : > { %p515_p10 = por %p83_p7, %p32_p0  ;;  %p519_p11 = por %p89_p8, %p38_p3 }
   0xf   : > { %s294_s24 = sshll.u32 %s443_s12, 9  ;;  %s280_s25 = sshll.u32 %s112_s23, 5 }
  0x10   : > { %s635_s21 = scalar_select %p515_p10, 1, 0 }
  0x11   : > { %s636_s22 = scalar_select %p519_p11, 1, 0 }
  0x12   : > { %s528_s28 = scalar_lea.hbm %s629_s0, %s294_s24  ;;  %s116_s29 = scalar_lea.vmem [#allocation2], %s280_s25 }
  0x13   : > { %s124_s30 = sshll.u32 %s116_s29, 4  ;;  %p532_p12 = pnand %p309_p9, %p505_p5  ;;  %s536_s30 = int_to_ptr.vmem [resolvable:$true] %s124_s30 }
  0x14   : > { %s538_s4 = scalar_lea.sflag [#allocation3], %s112_s23  ;;  %s347_s5 = scalar_lea.hbm %s528_s28, 512 }
  0x15   : > { %p348_p13 = scmp.ne.s32.totalorder %s528_s28, %s347_s5  ;;  %p349_p0 = pneg %p532_p12 }
  0x16   : > { %s352_s8 = scalar_lea.hbm %s629_s0, 2048  ;;  %p353_p3 = scmp.lt.u32.totalorder %s528_s28, %s629_s0 }
  0x17   : > { %p350_p1 = pnand %p349_p0, %p348_p13  ;;  %p354_p4 = scmp.lt.u32.totalorder %s352_s8, %s347_s5 }
  0x18   : > { %p356_p7 = scmp.lt.u32.totalorder %s347_s5, %s528_s28 }
  0x19   : > { %p351_p2 = pneg %p350_p1  ;;  %p355_p5 = por %p354_p4, %p353_p3 }
  0x1b   : > { %p357_p8 = por %p356_p7, %p355_p5 }
  0x1d   : > { %p358_p9 = pnand %p357_p8, %p351_p2 }
  0x1f   : > { %361 = shalt.err (!%p358_p9)
}
  0x20   : > { %s362_s17 = scalar_lea.vmem %s536_s30, 512  ;;  %s445_s19 = smov [#allocation2]  }
  0x21   : > { %p363_p13 = scmp.ne.s32.totalorder %s536_s30, %s362_s17  ;;  %s367_s23 = sshll.u32 %s445_s19, 4  ;;  %s368_s23 = int_to_ptr.vmem [resolvable:$false] %s367_s23 }
  0x22   : > { %s369_s24 = scalar_lea.vmem %s368_s23, 1024  ;;  %p370_p10 = scmp.lt.s32.totalorder %s536_s30, %s368_s23 }
  0x23   : > { %p365_p1 = pnand %p363_p13, %p349_p0  ;;  %p371_p3 = scmp.lt.s32.totalorder %s369_s24, %s362_s17 }
  0x25   : > { %p366_p11 = pneg %p365_p1  ;;  %p372_p4 = por %p371_p3, %p370_p10 }
  0x27   : > { %p373_p5 = pnand %p372_p4, %p366_p11 }
  0x29   : > { %376 = shalt.err (!%p373_p5)
}
  0x2a   : > { %s446_s25 = smov 256   ;;  %s447_s26 = smov 16  }
  0x2b   : > { %304 = dma.hbm_to_vmem [thread:$0]  (!%p532_p12), %s528_s28, 512, %s536_s30, %s538_s4, %s446_s25, %s446_s25, %s447_s26  }
  0x2c   : > { %p284_p0 = scmp.ge.s32.totalorder %s443_s12, 1  ;;  %p132_p2 = scmp.lt.s32.totalorder %s443_s12, 5 }
  0x2e   : > { %p133_p7 = pnand %p284_p0, %p132_p2 }
  0x2f   : > { %s569_s27 = sand.u32 (!%p133_p7), 1, %s435_s10  }
  0x30   : > { %136 = sbr.rel (%p133_p7) target bundleno = 83 (0x53), region = 28  ;;  %s285_s29 = sshll.u32 (!%p133_p7), %s569_s27, 5 }
  0x31   : > { %s139_s5 = scalar_lea.sflag (!%p133_p7), [#allocation3], %s569_s27  ;;  %s142_s6 = scalar_lea.vmem (!%p133_p7), [#allocation2], %s285_s29 }
  0x37   : > { %422 = dma.done.wait (%p509_p6), %s139_s5, 512  }
  0x38   : > { %424 = vsyncadd (%p509_p6), %s139_s5, 4294966784  ;;  %v171_v0 = vlaneseq  ;;  %s162_s28 = scalar_lea.vmem [#allocation5], %s285_s29  ;;  %s296_s3 = sshll.u32 %s487_s13, 9  ;;  %v165_v4 = vld [vmem:[%s142_s6] sm:$0xff]  ;;  %v166_v6 = vld [vmem:[%s142_s6 + $0x8] sm:$0xff] }
  0x39   : > { %s204_s30 = sshll.u32 %s162_s28, 4  ;;  %v169_v5 = vld [vmem:[%s630_s1] sm:$0x3]  ;;  %v167_v9 = vld [vmem:[%s142_s6 + $0x10] sm:$0xff]  ;;  %v168_v10 = vld [vmem:[%s142_s6 + $0x18] sm:$0xff]  ;;  %s586_s13 = scalar_lea.hbm %s631_s2, %s296_s3  ;;  %s581_s30 = int_to_ptr.vmem [resolvable:$true] %s204_s30 }
  0x3a   : > { %v172_v1 = vshrl.u32 %v171_v0, 7  ;;  %s190_s14 = scalar_lea.sflag [#allocation4], %s569_s27  ;;  %s377_s16 = scalar_lea.vmem %s581_s30, 512 }
  0x3b   : > { %p378_p6 = scmp.ne.s32.totalorder %s581_s30, %s377_s16  ;;  %p638_p10 = scmp.ne.s32.totalorder %s635_s21, 0 }
  0x3c   : > { %v173_v2 = vsub.s32 0, %v172_v1  ;;  %v177_v3 = vsub.s32 1, %v172_v1  ;;  %s448_s17 = smov [#allocation5]  }
  0x3d   : > { %p379_p11 = pnand %p378_p6, %p638_p10  ;;  %s381_s19 = sshll.u32 %s448_s17, 4  ;;  %s382_s19 = int_to_ptr.vmem [resolvable:$false] %s381_s19 }
  0x3e   : > { %v174_v7 = vrot.slane %v169_v5, %v173_v2  ;;  %v178_v8 = vrot.slane %v169_v5, %v177_v3  ;;  %s383_s23 = scalar_lea.vmem %s382_s19, 1024  ;;  %p384_p8 = scmp.lt.s32.totalorder %s581_s30, %s382_s19 }
  0x3f   : > { %p380_p12 = pneg %p379_p11  ;;  %p385_p9 = scmp.lt.s32.totalorder %s383_s23, %s377_s16 }
  0x40   : > { %v181_v11 = vmul.f32 %v174_v7, %v165_v4  ;;  %v182_v12 = vmul.f32 %v178_v8, %v166_v6  ;;  %v183_v13 = vmul.f32 %v174_v7, %v167_v9  ;;  %v184_v14 = vmul.f32 %v178_v8, %v168_v10 }
  0x41   : > { %p386_p13 = por %p385_p9, %p384_p8 }
  0x42   : > { %185 = vst [vmem:[%s162_s28] sm:$0xff] %v181_v11  ;;  %186 = vst [vmem:[%s162_s28 + $0x8] sm:$0xff] %v182_v12 }
  0x43   : > { %187 = vst [vmem:[%s162_s28 + $0x10] sm:$0xff] %v183_v13  ;;  %188 = vst [vmem:[%s162_s28 + $0x18] sm:$0xff] %v184_v14  ;;  %p387_p1 = pnand %p386_p13, %p380_p12 }
  0x45   : > { %390 = shalt.err (!%p387_p1)
}
  0x46   : > { %s391_s24 = scalar_lea.hbm %s586_s13, 512  ;;  %s395_s29 = scalar_lea.hbm %s631_s2, 2048 }
  0x47   : > { %p392_p3 = scmp.ne.s32.totalorder %s586_s13, %s391_s24  ;;  %p396_p0 = scmp.lt.u32.totalorder %s586_s13, %s631_s2 }
  0x48   : > { %p397_p2 = scmp.lt.u32.totalorder %s395_s29, %s391_s24  ;;  %p399_p6 = scmp.lt.u32.totalorder %s391_s24, %s586_s13 }
  0x49   : > { %p393_p4 = pnand %p392_p3, %p638_p10 }
  0x4a   : > { %p398_p7 = por %p397_p2, %p396_p0 }
  0x4b   : > { %p394_p5 = pneg %p393_p4 }
  0x4c   : > { %p400_p11 = por %p399_p6, %p398_p7 }
  0x4e   : > { %p401_p12 = pnand %p400_p11, %p394_p5 }
  0x50   : > { %404 = shalt.err (!%p401_p12)
}
  0x51   : > { %s449_s28 = smov 256   ;;  %s450_s3 = smov 16  }
  0x52   : > { %299 = dma.vmem_to_hbm [thread:$0]  (%p638_p10), %s581_s30, 512, %s586_s13, %s190_s14, %s449_s28, %s449_s28, %s450_s3  }
  0x53 PF: > { %p310_p8 = scmp.ge.s32.totalorder %s443_s12, 2  ;;  %s219_s4 = sand.u32 1, %s431_s9  }
  0x54   : > { %p639_p9 = scmp.ne.s32.totalorder %s636_s22, 0  ;;  %s220_s7 = scalar_lea.sflag [#allocation4], %s219_s4 }
  0x56   : > { %p306_p13 = pnand %p310_p8, %p639_p9 }
  0x58   : > { %426 = dma.done.wait (!%p306_p13), %s220_s7, 512  }
  0x59   : > { %428 = vsyncadd (!%p306_p13), %s220_s7, 4294966784  ;;  %p15_p1 = scmp.ge.s32.totalorder %s491_s15, 6   ;;  %s640_s9 = smov %s435_s10 }
  0x5a   : > { %s641_s10 = smov %s439_s11  ;;  %s642_s11 = smov %s503_s18 }
  0x5b   : > { %s643_s12 = smov %s491_s15  ;;  %17 = sbr.rel (!%p15_p1) target bundleno = 5 (0x5), region = 73 }
  0x62   :  { %225 = vsyncpa [#allocation3], 1 }
  0x63   :  { %227 = vsyncpa [#allocation3 + $0x1], 1 }
  0x64   :  { %228 = vsyncpa [#allocation4], 1 }
  0x65   :  { %230 = vsyncpa [#allocation4 + $0x1], 1 }

</bundles_post_ra>
